<compile_context>
chip_gen: v7x
topology: tpu7x:2x2x1
jax: 0.10.0
libtpu: 0.0.40
codegen_flags: <defaults>
</compile_context>

<pallas_src>
import functools

import jax
import jax.numpy as jnp
from jax.experimental import pallas as pl
from jax.experimental.pallas import tpu as pltpu


def _accuracy_kernel(logits_ref, labels_ref, out_ref, acc_ref, *,
                     tiles_per_split, num_blocks, needs_guard):
    s = pl.program_id(0)   # split axis (CORE_PARALLEL on v7x, size 1 elsewhere)
    i = pl.program_id(1)   # batch-tile within the split ("arbitrary" / reduction)

    @pl.when(i == 0)
    def _init():
        acc_ref[...] = jnp.zeros_like(acc_ref)

    def _accumulate():
        x = logits_ref[...]                                   # (tile_b, C)
        tb, c = x.shape
        # argmax over the class (lane) axis, first-occurrence tie-break
        # (matches torch/jnp). NaN rows get sentinel index C -> never correct.
        col_ids = jax.lax.broadcasted_iota(jnp.int32, (tb, c), 1)
        max_val = jnp.max(x, axis=-1, keepdims=True)          # XLU reduce #1
        preds = jnp.min(jnp.where(x == max_val, col_ids, jnp.int32(c)),
                        axis=-1, keepdims=True)               # XLU reduce #2
        # TODO(synk): v7x XLU trim - for bf16 pack an order-preserving 16-bit key
        # with the reversed column index into one int32 and do a single max reduce.
        # TODO(synk): for vocab-sized C, tile the class axis with a running
        # max / first-index carry instead of loading full (tile_b, C) rows.
        # Pad rows (partial last block) carry label -1 while preds are in [0, C],
        # so they can never match - no per-step iota/row-validity mask needed.
        correct = (preds == labels_ref[...]).astype(jnp.int32)
        acc_ref[...] += correct                               # pure VPU, deferred reduce

    if needs_guard:
        # Only the duplicated (index-clamped) overhang tiles of the last split need
        # protection; a single scalar pl.when replaces the old per-row mask.
        pl.when(s * tiles_per_split + i < num_blocks)(_accumulate)
    else:
        _accumulate()

    @pl.when(i == pl.num_programs(1) - 1)
    def _finalize():
        # Single cross-sublane reduce + lane-dense (8, 128) store per split.
        out_ref[...] = jnp.broadcast_to(
            jnp.sum(acc_ref[...]).astype(jnp.float32), out_ref.shape)


def _device_plan():
    """Generation-aware (vmem_limit_bytes, target_block_bytes, tensorcores/chip)."""
    kind = ""
    try:
        kind = jax.devices()[0].device_kind.lower()
    except Exception:
        pass
    if "v7" in kind or "7x" in kind:
        # v7x: 64 MiB physical VMEM per TC, 3.2 TB/s HBM, 2 TensorCores/chip.
        return 48 << 20, 10 << 20, 2
    if "v6" in kind:
        # v6e: 128 MiB physical VMEM, ~1.4 TB/s HBM, 1 TensorCore.
        return 64 << 20, 12 << 20, 1
    if "v5" in kind:
        # v5e (and v5p fallback): 128 MiB physical VMEM, slower HBM, treat as 1 TC.
        return 48 << 20, 8 << 20, 1
    # Unknown backend: conservative settings that fit every generation.
    return 32 << 20, 8 << 20, 1


def _pick_tile_b(n, c, itemsize, target_block_bytes, vmem_budget_bytes,
                 max_tile_rows=None):
    """Largest batch tile (multiple of 8) under both the per-step HBM byte target
    and the VMEM budget: 2x logits buffers + 2x (tile_b,1) int32 label buffers +
    1x (tile_b,1) int32 accumulator, all lane-padded to 128 lanes."""
    lanes_pad = ((c + 127) // 128) * 128
    row_hbm = max(1, c * itemsize)                        # raw HBM bytes moved per row
    row_vmem = 2 * lanes_pad * itemsize + 2 * 128 * 4 + 128 * 4
    rows = min(target_block_bytes // row_hbm, vmem_budget_bytes // row_vmem, 32768)
    n_pad8 = ((n + 7) // 8) * 8
    rows = min(int(rows), n_pad8)
    if max_tile_rows is not None:
        rows = min(rows, int(max_tile_rows))
    rows = max(8, rows - rows % 8)
    return rows


@functools.partial(jax.jit, static_argnames=("max_tile_rows", "force_splits"))
def _accuracy_from_class_scores(scores, labels, max_tile_rows=None, force_splits=None):
    """scores: (N, C) float (logits or softmaxes); labels: (N,) class indices."""
    n, c = scores.shape
    vmem_limit, target_block, n_cores = _device_plan()
    tile_b = _pick_tile_b(n, c, scores.dtype.itemsize, target_block,
                          vmem_limit - (6 << 20), max_tile_rows)
    num_blocks = -(-n // tile_b)

    if force_splits is not None:                 # test hook: exercise split path anywhere
        n_splits = force_splits if num_blocks >= force_splits else 1
        core_split = False
    else:
        n_splits = 2 if (n_cores >= 2 and num_blocks >= 2) else 1
        core_split = n_splits == 2               # v7x: map split axis onto both TCs
    tiles_per_split = -(-num_blocks // n_splits)
    needs_guard = n_splits * tiles_per_split > num_blocks

    padded_n = num_blocks * tile_b
    labels_i32 = labels.astype(jnp.int32).reshape(n, 1)
    if padded_n > n:
        labels_i32 = jnp.pad(labels_i32, ((0, padded_n - n), (0, 0)),
                             constant_values=-1)

    if needs_guard:
        def _blk(s, i):                          # clamp tail-split overhang tiles
            return jnp.minimum(s * tiles_per_split + i, num_blocks - 1)
    else:
        def _blk(s, i):
            return s * tiles_per_split + i

    kernel = functools.partial(_accuracy_kernel, tiles_per_split=tiles_per_split,
                               num_blocks=num_blocks, needs_guard=needs_guard)

    split_sem = pltpu.CORE_PARALLEL if core_split else pltpu.ARBITRARY

    partials = pl.pallas_call(
        kernel,
        out_shape=jax.ShapeDtypeStruct((n_splits * 8, 128), jnp.float32),
        grid_spec=pltpu.PrefetchScalarGridSpec(
            num_scalar_prefetch=0,
            grid=(n_splits, tiles_per_split),
            in_specs=[pl.BlockSpec((tile_b, c), lambda s, i: (_blk(s, i), 0)),
                      pl.BlockSpec((tile_b, 1), lambda s, i: (_blk(s, i), 0))],
            out_specs=pl.BlockSpec((8, 128), lambda s, i: (s, 0)),
            scratch_shapes=[pltpu.VMEM((tile_b, 1), jnp.int32)],
        ),
        compiler_params=pltpu.CompilerParams(
            dimension_semantics=(split_sem, pltpu.ARBITRARY),
            vmem_limit_bytes=vmem_limit,
        ),
    )(scores, labels_i32)

    counts = partials[0::8, 0]                   # (n_splits,) per-split correct counts
    return jnp.sum(counts) / jnp.float32(n)      # device scalar (no host sync)


class AccuracyPallas:
    """Pallas equivalent of Accuracy.forward; returns a device scalar
    (call float() on it where the original .item() behaviour is needed)."""

    def __call__(self, logits=None, labels=None, softmaxes=None, predictions=None,
                 **kwargs):
        if labels is None:
            raise ValueError("labels must be provided")
        if predictions is not None:
            # Predictions already computed: plain elementwise compare + mean
            # (no class-axis reduction for the kernel to fuse).
            correct = predictions.astype(jnp.int32) == labels.astype(jnp.int32)
            return jnp.mean(correct.astype(jnp.float32))
        if logits is not None:
            scores = logits
        elif softmaxes is not None:
            scores = softmaxes
        else:
            raise ValueError("Either logits or softmaxes must be provided")
        return _accuracy_from_class_scores(scores, labels)


if __name__ == "__main__":
    key = jax.random.PRNGKey(0)
    k1, k2, k3, k4, k5, k6, k7, k8 = jax.random.split(key, 8)
    metric = AccuracyPallas()

    # 1) float32 logits, single tile.
    N, C = 16, 32
    logits = jax.random.normal(k1, (N, C), dtype=jnp.float32)
    labels = jax.random.randint(k2, (N,), 0, C, dtype=jnp.int32)
    acc = jax.block_until_ready(metric(logits=logits, labels=labels))
    ref = jnp.mean((jnp.argmax(logits, axis=1) == labels).astype(jnp.float32))
    assert abs(float(acc) - float(ref)) < 1e-6, (float(acc), float(ref))

    # 2) bf16 logits, batch not a multiple of 8 (partial block + -1 label padding).
    N2, C2 = 13, 10
    logits2 = jax.random.normal(k3, (N2, C2), dtype=jnp.bfloat16)
    labels2 = jax.random.randint(k4, (N2,), 0, C2, dtype=jnp.int32)
    acc2 = jax.block_until_ready(metric(logits=logits2, labels=labels2))
    ref2 = jnp.mean((jnp.argmax(logits2, axis=1) == labels2).astype(jnp.float32))
    assert abs(float(acc2) - float(ref2)) < 1e-6, (float(acc2), float(ref2))

    # 3) multi-tile + forced 2-way split + clamped/guarded overhang tile.
    N3, C3 = 40, 32
    logits3 = jax.random.normal(k5, (N3, C3), dtype=jnp.float32)
    labels3 = jax.random.randint(k6, (N3,), 0, C3, dtype=jnp.int32)
    acc3 = jax.block_until_ready(
        _accuracy_from_class_scores(logits3, labels3, max_tile_rows=16, force_splits=2))
    ref3 = jnp.mean((jnp.argmax(logits3, axis=1) == labels3).astype(jnp.float32))
    assert abs(float(acc3) - float(ref3)) < 1e-6, (float(acc3), float(ref3))

    # 4) softmaxes path.
    soft = jax.nn.softmax(jax.random.normal(k7, (N, C), dtype=jnp.float32), axis=1)
    acc4 = jax.block_until_ready(metric(softmaxes=soft, labels=labels))
    ref4 = jnp.mean((jnp.argmax(soft, axis=1) == labels).astype(jnp.float32))
    assert abs(float(acc4) - float(ref4)) < 1e-6, (float(acc4), float(ref4))

    # 5) predictions-given path (pure elementwise; no kernel needed).
    preds = jax.random.randint(k8, (N,), 0, C, dtype=jnp.int32)
    acc5 = jax.block_until_ready(metric(predictions=preds, labels=labels))
    ref5 = jnp.mean((preds == labels).astype(jnp.float32))
    assert abs(float(acc5) - float(ref5)) < 1e-6, (float(acc5), float(ref5))

    print("KERNEL_OK")
</pallas_src>

<mosaic_0001>
module attributes {stable_mosaic.version = 11 : i64} {
  func.func @_accuracy_kernel(%arg0: i32, %arg1: i32, %arg2: memref<16x32xf32, #tpu.memory_space<vmem>>, %arg3: memref<16x1xi32, #tpu.memory_space<vmem>>, %arg4: memref<8x128xf32, #tpu.memory_space<vmem>>, %arg5: memref<16x1xi32, #tpu.memory_space<vmem>>) attributes {dimension_semantics = [#tpu.dimension_semantics<arbitrary>, #tpu.dimension_semantics<arbitrary>], iteration_bounds = array<i64: 1, 1>, scalar_prefetch = 0 : i64, scratch_operands = 1 : i64, tpu.core_type = #tpu.core_type<tc>, window_params = [{transform_indices = @transform_0, window_bounds = array<i64: 16, 32>}, {transform_indices = @transform_1, window_bounds = array<i64: 16, 1>}, {transform_indices = @transform_2, window_bounds = array<i64: 8, 128>}]} {
    %c0_i32 = arith.constant 0 : i32
    %0 = arith.cmpi eq, %arg1, %c0_i32 : i32
    %1 = arith.extui %0 : i1 to i32
    %c0_i32_0 = arith.constant 0 : i32
    %2 = arith.cmpi ne, %1, %c0_i32_0 : i32
    scf.if %2 {
      %c0_i32_11 = arith.constant 0 : i32
      %22 = vector.broadcast %c0_i32_11 : i32 to vector<16x1xi32>
      %c0_12 = arith.constant 0 : index
      %c0_13 = arith.constant 0 : index
      %23 = vector.load %arg5[%c0_12, %c0_13] : memref<16x1xi32, #tpu.memory_space<vmem>>, vector<16x1xi32>
      tpu.vector_store %arg5[%c0_12, %c0_13], %22 {strides = array<i32>} : memref<16x1xi32, #tpu.memory_space<vmem>>, vector<16x1xi32>,
    } else {
    }
    %c0 = arith.constant 0 : index
    %c0_1 = arith.constant 0 : index
    %3 = vector.load %arg2[%c0, %c0_1] : memref<16x32xf32, #tpu.memory_space<vmem>>, vector<16x32xf32>
    %4 = tpu.iota {dimensions = array<i32: 1>} : vector<16x32xi32>
    %cst = arith.constant dense<0xFF800000> : vector<16xf32>
    %5 = vector.multi_reduction <maximumf>, %3, %cst [1] : vector<16x32xf32> to vector<16xf32>
    %6 = vector.shape_cast %5 : vector<16xf32> to vector<16x1xf32>
    %7 = vector.broadcast %6 : vector<16x1xf32> to vector<16x32xf32>
    %8 = arith.cmpf oeq, %3, %7 : vector<16x32xf32>
    %c32_i32 = arith.constant 32 : i32
    %9 = vector.broadcast %c32_i32 : i32 to vector<16x32xi32>
    %10 = arith.select %8, %4, %9 : vector<16x32xi1>, vector<16x32xi32>
    %cst_2 = arith.constant dense<2147483647> : vector<16xi32>
    %11 = vector.multi_reduction <minsi>, %10, %cst_2 [1] : vector<16x32xi32> to vector<16xi32>
    %12 = vector.shape_cast %11 : vector<16xi32> to vector<16x1xi32>
    %c0_3 = arith.constant 0 : index
    %c0_4 = arith.constant 0 : index
    %13 = vector.load %arg3[%c0_3, %c0_4] : memref<16x1xi32, #tpu.memory_space<vmem>>, vector<16x1xi32>
    %14 = arith.cmpi eq, %12, %13 : vector<16x1xi32>
    %15 = arith.extui %14 : vector<16x1xi1> to vector<16x1xi32>
    %c0_5 = arith.constant 0 : index
    %c0_6 = arith.constant 0 : index
    %16 = vector.load %arg5[%c0_5, %c0_6] : memref<16x1xi32, #tpu.memory_space<vmem>>, vector<16x1xi32>
    %17 = arith.addi %16, %15 : vector<16x1xi32>
    %c0_7 = arith.constant 0 : index
    %c0_8 = arith.constant 0 : index
    %18 = vector.load %arg5[%c0_7, %c0_8] : memref<16x1xi32, #tpu.memory_space<vmem>>, vector<16x1xi32>
    tpu.vector_store %arg5[%c0_7, %c0_8], %17 {strides = array<i32>} : memref<16x1xi32, #tpu.memory_space<vmem>>, vector<16x1xi32>,
    %c0_i32_9 = arith.constant 0 : i32
    %19 = arith.cmpi eq, %arg1, %c0_i32_9 : i32
    %20 = arith.extui %19 : i1 to i32
    %c0_i32_10 = arith.constant 0 : i32
    %21 = arith.cmpi ne, %20, %c0_i32_10 : i32
    scf.if %21 {
      %c0_11 = arith.constant 0 : index
      %c0_12 = arith.constant 0 : index
      %22 = vector.load %arg5[%c0_11, %c0_12] : memref<16x1xi32, #tpu.memory_space<vmem>>, vector<16x1xi32>
      %23 = vector.shape_cast %22 : vector<16x1xi32> to vector<1x16x1xi32>
      %cst_13 = arith.constant dense<0> : vector<1xi32>
      %24 = vector.multi_reduction <add>, %23, %cst_13 [1, 2] : vector<1x16x1xi32> to vector<1xi32>
      %25 = vector.shape_cast %24 : vector<1xi32> to vector<1x1x1xi32>
      %26 = vector.extract %25[0, 0, 0] : i32 from vector<1x1x1xi32>
      %27 = arith.sitofp %26 : i32 to f32
      %28 = vector.broadcast %27 : f32 to vector<8x128xf32>
      %c0_14 = arith.constant 0 : index
      %c0_15 = arith.constant 0 : index
      %29 = vector.load %arg4[%c0_14, %c0_15] : memref<8x128xf32, #tpu.memory_space<vmem>>, vector<8x128xf32>
      tpu.vector_store %arg4[%c0_14, %c0_15], %28 {strides = array<i32>} : memref<8x128xf32, #tpu.memory_space<vmem>>, vector<8x128xf32>,
    } else {
    }
    return
  }
  func.func @transform_0(%arg0: i32, %arg1: i32) -> (i32, i32) {
    %c1_i32 = arith.constant 1 : i32
    %0 = arith.muli %arg0, %c1_i32 : i32
    %1 = arith.addi %0, %arg1 : i32
    %c0_i32 = arith.constant 0 : i32
    %c0_i32_0 = arith.constant 0 : i32
    return %1, %c0_i32 : i32, i32
  }
  func.func @transform_1(%arg0: i32, %arg1: i32) -> (i32, i32) {
    %c1_i32 = arith.constant 1 : i32
    %0 = arith.muli %arg0, %c1_i32 : i32
    %1 = arith.addi %0, %arg1 : i32
    %c0_i32 = arith.constant 0 : i32
    %c0_i32_0 = arith.constant 0 : i32
    return %1, %c0_i32 : i32, i32
  }
  func.func @transform_2(%arg0: i32, %arg1: i32) -> (i32, i32) {
    %c0_i32 = arith.constant 0 : i32
    %c0_i32_0 = arith.constant 0 : i32
    return %arg0, %c0_i32 : i32, i32
  }
}

</mosaic_0001>

<bundles_post_ra>
// kernel: _accuracy_from_class_scores.1
= control target key start
LH: loop header
LB: loop body
LE: loop exit
PB: predicated region body
PF: predicated region fallthrough
CT: control target
= control target key end

     0   :  { %vm66_vm0 = vcmask 261120   ;;  %v64_v4 = vlaneseq  ;;  %vm59_vm3 = vcmask 7168   ;;  %v169_v16 = vmov 0   ;;  %s210_s0 = inlined_call_operand.vmem [shape: f32[16,32], index: 0, kind: input, shape index: {}]   ;;  %s211_s1 = inlined_call_operand.vmem [shape: s32[16,1], index: 1, kind: input, shape index: {}]   ;;  %s212_s2 = inlined_call_operand.vmem [shape: f32[8,128], index: 2, kind: output, shape index: {}]  }
   0x1   :  { %v62_v0 = vld [vmem:[%s210_s0] sm:$0xff]  ;;  %v63_v1 = vld [vmem:[%s210_s0 + $0x8] sm:$0xff]  ;;  %60 = vst.msk [vmem:[#allocation2] sm:$0xff] %vm59_vm3, %v169_v16  ;;  %61 = vst.msk [vmem:[#allocation2 + $0x8] sm:$0xff] %vm59_vm3, %v169_v16 }
   0x2   :  { %v67_v2 = vsel %vm66_vm0, %v62_v0, -inf  ;;  %v70_v3 = vsel %vm66_vm0, %v63_v1, -inf  ;;  %v65_v5 = vand.u32 127, %v64_v4  ;;  %v107_v30 = vld [vmem:[%s211_s1] sm:$0xff]  ;;  %v108_v37 = vld [vmem:[%s211_s1 + $0x8] sm:$0xff] }
   0x3   :  { %68 = vmax.xlane.f32.xlu0 %v67_v2 }
   0x7   :  { %71 = vmax.xlane.f32.xlu0 %v70_v3 }
   0x8   :  { %v113_v32 = vld [vmem:[#allocation2] sm:$0xff]  ;;  %v114_v40 = vld [vmem:[#allocation2 + $0x8] sm:$0xff] }
  0x90   :  { %v69_v6 = vpop.xlane.xlu0 %68 }
  0x91   :  { %vm73_vm1 = vcmp.eq.f32.partialorder %v62_v0, %v69_v6 }
  0x92   :  { %v75_v7 = vsel %vm73_vm1, %v65_v5, 32 }
  0x93   :  { %v77_v8 = vsel %vm66_vm0, %v75_v7, 2147483647 }
  0x94   :  { %v72_v9 = vpop.xlane.xlu0 %71  ;;  %v79_v10 = vshra.s32 %v77_v8, 16  ;;  %v78_v17 = vand.u32 65535, %v77_v8 }
  0x95   :  { %vm74_vm2 = vcmp.eq.f32.partialorder %v63_v1, %v72_v9 }
  0x96   :  { %v76_v11 = vsel %vm74_vm2, %v65_v5, 32  ;;  %v81_v12 = vcvt.s32.f32 %v79_v10  ;;  %v80_v19 = vcvt.s32.f32 %v78_v17 }
  0x97   :  { %v92_v13 = vsel %vm66_vm0, %v76_v11, 2147483647 }
  0x98   :  { %82 = vmin.xlane.f32.xlu1 %v81_v12  ;;  %v94_v14 = vshra.s32 %v92_v13, 16  ;;  %v93_v20 = vand.u32 65535, %v92_v13 }
  0x9a   :  { %v96_v15 = vcvt.s32.f32 %v94_v14  ;;  %v95_v23 = vcvt.s32.f32 %v93_v20 }
  0x9c   :  { %97 = vmin.xlane.f32.xlu1 %v96_v15 }
 0x125   :  { %v83_v18 = vpop.xlane.xlu1 %82 }
 0x126   :  { %vm84_vm4 = vcmp.eq.f32.partialorder %v81_v12, %v83_v18  ;;  %v89_v25 = vcvt.f32.s32 %v83_v18 }
 0x127   :  { %v85_v21 = vsel %vm84_vm4, %v80_v19, inf }
 0x128   :  { %86 = vmin.xlane.f32.xlu0 %v85_v21  ;;  %v90_v27 = vshll.u32 %v89_v25, 16 }
 0x129   :  { %v98_v22 = vpop.xlane.xlu1 %97 }
 0x12a   :  { %vm99_vm5 = vcmp.eq.f32.partialorder %v96_v15, %v98_v22  ;;  %v104_v28 = vcvt.f32.s32 %v98_v22 }
 0x12b   :  { %v100_v24 = vsel %vm99_vm5, %v95_v23, inf }
 0x12c   :  { %101 = vmin.xlane.f32.xlu1 %v100_v24  ;;  %v105_v34 = vshll.u32 %v104_v28, 16 }
 0x1b5   :  { %v87_v26 = vpop.xlane.xlu0 %86 }
 0x1b6   :  { %v88_v29 = vcvt.f32.s32 %v87_v26 }
 0x1b8   :  { %v91_v31 = vadd.s32 %v90_v27, %v88_v29 }
 0x1b9   :  { %v102_v33 = vpop.xlane.xlu1 %101 }
 0x1ba   :  { %vm109_vm6 = vcmp.eq.s32.totalorder %v91_v31, %v107_v30  ;;  %v103_v35 = vcvt.f32.s32 %v102_v33 }
 0x1bb   :  { %v111_v36 = vsel %vm109_vm6, 1, %v169_v16 }
 0x1bc   :  { %v115_v38 = vadd.s32 %v113_v32, %v111_v36  ;;  %v106_v39 = vadd.s32 %v105_v34, %v103_v35 }
 0x1be   :  { %118 = vst.msk [vmem:[#allocation2] sm:$0xff] %vm59_vm3, %v115_v38  ;;  %vm110_vm7 = vcmp.eq.s32.totalorder %v106_v39, %v108_v37 }
 0x1bf   :  { %v112_v41 = vsel %vm110_vm7, 1, %v169_v16 }
 0x1c0   :  { %v116_v42 = vadd.s32 %v114_v40, %v112_v41 }
 0x1c2   :  { %119 = vst.msk [vmem:[#allocation2 + $0x8] sm:$0xff] %vm59_vm3, %v116_v42 }
 0x1c5   :  { %v123_v43 = vld [vmem:[#allocation2] sm:$0xff] }
 0x1c6   :  { %v125_v45 = vsel %vm59_vm3, %v123_v43, 0 }
 0x1c9   :  { %v124_v44 = vld [vmem:[#allocation2 + $0x8] sm:$0xff] }
 0x1ca   :  { %v126_v46 = vsel %vm59_vm3, %v124_v44, 0 }
 0x1cb   :  { %v127_v47 = vadd.s32 %v126_v46, %v125_v45 }
 0x1cd   :  { %v129_v48 = vshrl.u32 %v127_v47, 16  ;;  %v128_v49 = vand.u32 65535, %v127_v47 }
 0x1cf   :  { %v131_v50 = vcvt.s32.f32 %v129_v48  ;;  %v130_v51 = vcvt.s32.f32 %v128_v49 }
 0x1d1   :  { %134 = vadd.xlane.f32.xlu0 %v131_v50  ;;  %132 = vadd.xlane.f32.xlu1 %v130_v51 }
 0x25e   :  { %v135_v52 = vpop.xlane.xlu0 %134  ;;  %v133_v53 = vpop.xlane.xlu1 %132 }
 0x25f   :  { %v137_v54 = vcvt.f32.s32 %v135_v52  ;;  %v136_v56 = vcvt.f32.s32 %v133_v53 }
 0x261   :  { %v138_v55 = vshll.u32 %v137_v54, 16 }
 0x263   :  { %v139_v57 = vadd.s32 %v138_v55, %v136_v56 }
 0x265   :  { %v140_v58 = vrot.slane %v139_v57, 4 }
 0x267   :  { %v141_v59 = vadd.s32 %v140_v58, %v139_v57 }
 0x269   :  { %v142_v60 = vrot.slane %v141_v59, 2 }
 0x26b   :  { %v143_v61 = vadd.s32 %v142_v60, %v141_v59 }
 0x26d   :  { %v144_v62 = vrot.slane %v143_v61, 1 }
 0x26f   :  { %v145_v63 = vadd.s32 %v144_v62, %v143_v61 }
 0x271   :  { %166 = vpush %v145_v63 }
 0x2a2   :  { %s167_s1 = spop %166 }
 0x2a3   :  { %s147_s16 = scvt.s32.f32 %s167_s1 }
 0x2a5   :  { %v148_v0 = vstv %s147_s16 }
 0x2a6   :  { %149 = vst [vmem:[%s212_s2] sm:$0xff] %v148_v0 }

</bundles_post_ra>
